<compile_context>
chip_gen: v7x
topology: tpu7x:2x2x1
jax: 0.10.0
libtpu: 0.0.40
codegen_flags: <defaults>
</compile_context>

<pallas_src>
import jax
import jax.numpy as jnp
from jax.experimental import pallas as pl
from jax.experimental.pallas import tpu as pltpu


def _round_up(x, m):
    return (x + m - 1) // m * m


# ---------------------------------------------------------------------------
# Layer-1 kernel:
#   acc  = Â[i, :] @ X            (accumulated over K tiles, f32 accumulator)
#   H    = relu(acc @ W1 + b1)    (epilogue, f32 VPU math)
#   M    = H @ W2                 (layer-2 feature transform fused here, bf16 out)
# ---------------------------------------------------------------------------
def _layer1_kernel(a_ref, x_ref, w1_ref, b1_ref, w2_ref, m_ref, acc_ref):
    k = pl.program_id(1)

    @pl.when(k == 0)
    def _():
        acc_ref[...] = jnp.zeros_like(acc_ref)

    acc_ref[...] += jnp.dot(a_ref[...], x_ref[...],
                            preferred_element_type=jnp.float32)

    @pl.when(k == pl.num_programs(1) - 1)
    def _():
        p = acc_ref[...]                                             # (tm, c_pad) f32
        h = jnp.dot(p.astype(jnp.bfloat16), w1_ref[...],
                    preferred_element_type=jnp.float32)              # (tm, hid_pad) f32
        h = jnp.maximum(h + b1_ref[...], 0.0)                        # bias + ReLU in f32
        m_ref[...] = jnp.dot(h.astype(jnp.bfloat16), w2_ref[...],
                             preferred_element_type=jnp.float32).astype(m_ref.dtype)


# ---------------------------------------------------------------------------
# Layer-2 kernel (propagation only):  out = Â @ M + b2
# ---------------------------------------------------------------------------
def _layer2_kernel(a_ref, m_ref, b2_ref, out_ref, acc_ref):
    k = pl.program_id(1)

    @pl.when(k == 0)
    def _():
        acc_ref[...] = jnp.zeros_like(acc_ref)

    acc_ref[...] += jnp.dot(a_ref[...], m_ref[...],
                            preferred_element_type=jnp.float32)

    @pl.when(k == pl.num_programs(1) - 1)
    def _():
        out_ref[...] = acc_ref[...] + b2_ref[...]


def encoder_gcn(x, edge_index, w1, b1, w2, b2):
    """x: [N, C_in] f32, edge_index: [2, E] int32 (duplicate edges accumulate, PyG-style sum)."""
    n, c_in = x.shape
    hid = w1.shape[1]
    out_c = w2.shape[1]
    src, dst = edge_index[0], edge_index[1]

    # ---- tile / padding geometry -------------------------------------------------
    TILE = 512                                       # 128-aligned, <=512 keeps v7x VMEM happy
    n_pad = _round_up(n, 128) if n <= TILE else _round_up(n, TILE)
    tm = tk = min(TILE, n_pad)
    c_pad = _round_up(c_in, 128)
    hid_pad = _round_up(hid, 128)
    out_pad = _round_up(out_c, 128)

    # ---- glue (plain JAX): dense normalized adjacency  D^-1/2 (A+I) D^-1/2 --------
    a = jnp.zeros((n_pad, n_pad), jnp.float32).at[dst, src].add(1.0)
    a = a.at[jnp.arange(n), jnp.arange(n)].add(1.0)               # self-loops (real nodes)
    deg = jnp.sum(a, axis=1)                                      # padded rows -> deg 0
    dinv = jnp.where(deg > 0, jax.lax.rsqrt(deg), 0.0)
    a_hat = (dinv[:, None] * a * dinv[None, :]).astype(jnp.bfloat16)

    # ---- lane-pad features / weights / biases to 128 (zeros => no leakage) --------
    xp = jnp.zeros((n_pad, c_pad), jnp.bfloat16).at[:n, :c_in].set(x.astype(jnp.bfloat16))
    w1p = jnp.zeros((c_pad, hid_pad), jnp.bfloat16).at[:c_in, :hid].set(w1.astype(jnp.bfloat16))
    b1p = jnp.zeros((1, hid_pad), jnp.float32).at[0, :hid].set(b1)
    w2p = jnp.zeros((hid_pad, out_pad), jnp.bfloat16).at[:hid, :out_c].set(w2.astype(jnp.bfloat16))
    b2p = jnp.zeros((1, out_pad), jnp.float32).at[0, :out_c].set(b2)

    grid = (n_pad // tm, n_pad // tk)
    cparams = pltpu.CompilerParams(dimension_semantics=("parallel", "arbitrary"))

    # ---- layer 1 (+ fused layer-2 feature transform):  M = relu(ÂX W1 + b1) W2 ----
    m = pl.pallas_call(
        _layer1_kernel,
        out_shape=jax.ShapeDtypeStruct((n_pad, out_pad), jnp.bfloat16),
        grid_spec=pltpu.PrefetchScalarGridSpec(
            num_scalar_prefetch=0,
            grid=grid,
            in_specs=[
                pl.BlockSpec((tm, tk), lambda i, k: (i, k)),            # Â tile
                pl.BlockSpec((tk, c_pad), lambda i, k: (k, 0)),         # X tile
                pl.BlockSpec((c_pad, hid_pad), lambda i, k: (0, 0)),    # W1 (resident)
                pl.BlockSpec((1, hid_pad), lambda i, k: (0, 0)),        # b1
                pl.BlockSpec((hid_pad, out_pad), lambda i, k: (0, 0)),  # W2 (resident)
            ],
            out_specs=pl.BlockSpec((tm, out_pad), lambda i, k: (i, 0)),
            scratch_shapes=[pltpu.VMEM((tm, c_pad), jnp.float32)],
        ),
        compiler_params=cparams,
        cost_estimate=pl.CostEstimate(
            flops=2 * n_pad * n_pad * c_pad
                  + 2 * n_pad * c_pad * hid_pad
                  + 2 * n_pad * hid_pad * out_pad,
            transcendentals=0,
            bytes_accessed=2 * n_pad * n_pad + 2 * n_pad * c_pad
                           + 2 * c_pad * hid_pad + 4 * hid_pad
                           + 2 * hid_pad * out_pad + 2 * n_pad * out_pad),
    )(a_hat, xp, w1p, b1p, w2p)

    # ---- layer 2 propagation:  out = Â M + b2 --------------------------------------
    out = pl.pallas_call(
        _layer2_kernel,
        out_shape=jax.ShapeDtypeStruct((n_pad, out_pad), jnp.float32),
        grid_spec=pltpu.PrefetchScalarGridSpec(
            num_scalar_prefetch=0,
            grid=grid,
            in_specs=[
                pl.BlockSpec((tm, tk), lambda i, k: (i, k)),            # Â tile
                pl.BlockSpec((tk, out_pad), lambda i, k: (k, 0)),       # M tile
                pl.BlockSpec((1, out_pad), lambda i, k: (0, 0)),        # b2
            ],
            out_specs=pl.BlockSpec((tm, out_pad), lambda i, k: (i, 0)),
            scratch_shapes=[pltpu.VMEM((tm, out_pad), jnp.float32)],
        ),
        compiler_params=cparams,
        cost_estimate=pl.CostEstimate(
            flops=2 * n_pad * n_pad * out_pad,
            transcendentals=0,
            bytes_accessed=2 * n_pad * n_pad + 2 * n_pad * out_pad
                           + 4 * out_pad + 4 * n_pad * out_pad),
    )(a_hat, m, b2p)

    return out[:n, :out_c]


def glorot(key, shape):
    fan_in, fan_out = shape
    limit = jnp.sqrt(6.0 / (fan_in + fan_out))
    return jax.random.uniform(key, shape, jnp.float32, -limit, limit)


if __name__ == "__main__":
    key = jax.random.PRNGKey(0)
    k_x, k_src, k_off, k_w1, k_w2 = jax.random.split(key, 5)

    # Small shapes consistent with the module: N nodes, in_channels, out_channels=16.
    N = 16
    in_channels = 8
    out_channels = 16          # module default -> conv1: 8->32, conv2: 32->16
    hidden = 2 * out_channels
    E = 32

    x = jax.random.normal(k_x, (N, in_channels), jnp.float32)

    # random edges, no self-loops
    src = jax.random.randint(k_src, (E,), 0, N, jnp.int32)
    off = jax.random.randint(k_off, (E,), 1, N, jnp.int32)
    dst = (src + off) % N
    edge_index = jnp.stack([src, dst], axis=0)

    # deterministic parameter init (glorot weights, zero bias), matching GCNConv shapes
    w1 = glorot(k_w1, (in_channels, hidden))
    b1 = jnp.zeros((hidden,), jnp.float32)
    w2 = glorot(k_w2, (hidden, out_channels))
    b2 = jnp.zeros((out_channels,), jnp.float32)

    out = encoder_gcn(x, edge_index, w1, b1, w2, b2)
    out = jax.block_until_ready(out)
    assert out.shape == (N, out_channels)

    # pure-JAX f32 reference (bf16 MXU inputs => loose tolerance)
    a = jnp.zeros((N, N), jnp.float32).at[dst, src].add(1.0) + jnp.eye(N, dtype=jnp.float32)
    d = jnp.sum(a, axis=1)
    dinv = jnp.where(d > 0, 1.0 / jnp.sqrt(d), 0.0)
    a_hat = dinv[:, None] * a * dinv[None, :]
    h_ref = jnp.maximum(a_hat @ (x @ w1) + b1, 0.0)
    ref = a_hat @ (h_ref @ w2) + b2
    assert jnp.allclose(out, ref, atol=5e-2, rtol=5e-2), float(jnp.max(jnp.abs(out - ref)))

    print("KERNEL_OK")
</pallas_src>

<mosaic_0001>
module attributes {stable_mosaic.version = 11 : i64} {
  func.func @_layer1_kernel(%arg0: i32, %arg1: i32, %arg2: memref<128x128xbf16, #tpu.memory_space<vmem>>, %arg3: memref<128x128xbf16, #tpu.memory_space<vmem>>, %arg4: memref<128x128xbf16, #tpu.memory_space<vmem>>, %arg5: memref<1x128xf32, #tpu.memory_space<vmem>>, %arg6: memref<128x128xbf16, #tpu.memory_space<vmem>>, %arg7: memref<128x128xbf16, #tpu.memory_space<vmem>>, %arg8: memref<128x128xf32, #tpu.memory_space<vmem>>) attributes {dimension_semantics = [#tpu.dimension_semantics<parallel>, #tpu.dimension_semantics<arbitrary>], iteration_bounds = array<i64: 1, 1>, scalar_prefetch = 0 : i64, scratch_operands = 1 : i64, tpu.core_type = #tpu.core_type<tc>, window_params = [{transform_indices = @transform_0, window_bounds = array<i64: 128, 128>}, {transform_indices = @transform_1, window_bounds = array<i64: 128, 128>}, {pipeline_mode = #tpu.pipeline_mode<synchronous>, transform_indices = @transform_2, window_bounds = array<i64: 128, 128>}, {pipeline_mode = #tpu.pipeline_mode<synchronous>, transform_indices = @transform_3, window_bounds = array<i64: 1, 128>}, {pipeline_mode = #tpu.pipeline_mode<synchronous>, transform_indices = @transform_4, window_bounds = array<i64: 128, 128>}, {transform_indices = @transform_5, window_bounds = array<i64: 128, 128>}]} {
    %c0_i32 = arith.constant 0 : i32
    %0 = arith.cmpi eq, %arg1, %c0_i32 : i32
    %1 = arith.extui %0 : i1 to i32
    %c0_i32_0 = arith.constant 0 : i32
    %2 = arith.cmpi ne, %1, %c0_i32_0 : i32
    scf.if %2 {
      %cst_10 = arith.constant 0.000000e+00 : f32
      %12 = vector.broadcast %cst_10 : f32 to vector<128x128xf32>
      %c0_11 = arith.constant 0 : index
      %c0_12 = arith.constant 0 : index
      %13 = vector.load %arg8[%c0_11, %c0_12] : memref<128x128xf32, #tpu.memory_space<vmem>>, vector<128x128xf32>
      tpu.vector_store %arg8[%c0_11, %c0_12], %12 {strides = array<i32>} : memref<128x128xf32, #tpu.memory_space<vmem>>, vector<128x128xf32>,
    } else {
    }
    %c0 = arith.constant 0 : index
    %c0_1 = arith.constant 0 : index
    %3 = vector.load %arg8[%c0, %c0_1] : memref<128x128xf32, #tpu.memory_space<vmem>>, vector<128x128xf32>
    %c0_2 = arith.constant 0 : index
    %c0_3 = arith.constant 0 : index
    %4 = vector.load %arg2[%c0_2, %c0_3] : memref<128x128xbf16, #tpu.memory_space<vmem>>, vector<128x128xbf16>
    %c0_4 = arith.constant 0 : index
    %c0_5 = arith.constant 0 : index
    %5 = vector.load %arg3[%c0_4, %c0_5] : memref<128x128xbf16, #tpu.memory_space<vmem>>, vector<128x128xbf16>
    %cst = arith.constant dense<0.000000e+00> : vector<128x128xf32>
    %6 = tpu.matmul %4, %5, %cst {dimension_numbers = #tpu.dot_dimension_numbers<[1], [0], [0], [1], [0, 0, 1, 1], [], []>} : vector<128x128xbf16>, vector<128x128xbf16>, vector<128x128xf32> -> vector<128x128xf32>
    %7 = arith.addf %3, %6 : vector<128x128xf32>
    %c0_6 = arith.constant 0 : index
    %c0_7 = arith.constant 0 : index
    %8 = vector.load %arg8[%c0_6, %c0_7] : memref<128x128xf32, #tpu.memory_space<vmem>>, vector<128x128xf32>
    tpu.vector_store %arg8[%c0_6, %c0_7], %7 {strides = array<i32>} : memref<128x128xf32, #tpu.memory_space<vmem>>, vector<128x128xf32>,
    %c0_i32_8 = arith.constant 0 : i32
    %9 = arith.cmpi eq, %arg1, %c0_i32_8 : i32
    %10 = arith.extui %9 : i1 to i32
    %c0_i32_9 = arith.constant 0 : i32
    %11 = arith.cmpi ne, %10, %c0_i32_9 : i32
    scf.if %11 {
      %c0_10 = arith.constant 0 : index
      %c0_11 = arith.constant 0 : index
      %12 = vector.load %arg8[%c0_10, %c0_11] : memref<128x128xf32, #tpu.memory_space<vmem>>, vector<128x128xf32>
      %13 = arith.truncf %12 : vector<128x128xf32> to vector<128x128xbf16>
      %c0_12 = arith.constant 0 : index
      %c0_13 = arith.constant 0 : index
      %14 = vector.load %arg4[%c0_12, %c0_13] : memref<128x128xbf16, #tpu.memory_space<vmem>>, vector<128x128xbf16>
      %cst_14 = arith.constant dense<0.000000e+00> : vector<128x128xf32>
      %15 = tpu.matmul %13, %14, %cst_14 {dimension_numbers = #tpu.dot_dimension_numbers<[1], [0], [0], [1], [0, 0, 1, 1], [], []>} : vector<128x128xbf16>, vector<128x128xbf16>, vector<128x128xf32> -> vector<128x128xf32>
      %c0_15 = arith.constant 0 : index
      %c0_16 = arith.constant 0 : index
      %16 = vector.load %arg5[%c0_15, %c0_16] : memref<1x128xf32, #tpu.memory_space<vmem>>, vector<1x128xf32>
      %17 = vector.broadcast %16 : vector<1x128xf32> to vector<128x128xf32>
      %18 = arith.addf %15, %17 : vector<128x128xf32>
      %cst_17 = arith.constant 0.000000e+00 : f32
      %19 = vector.broadcast %cst_17 : f32 to vector<128x128xf32>
      %20 = arith.maximumf %18, %19 : vector<128x128xf32>
      %21 = arith.truncf %20 : vector<128x128xf32> to vector<128x128xbf16>
      %c0_18 = arith.constant 0 : index
      %c0_19 = arith.constant 0 : index
      %22 = vector.load %arg6[%c0_18, %c0_19] : memref<128x128xbf16, #tpu.memory_space<vmem>>, vector<128x128xbf16>
      %cst_20 = arith.constant dense<0.000000e+00> : vector<128x128xf32>
      %23 = tpu.matmul %21, %22, %cst_20 {dimension_numbers = #tpu.dot_dimension_numbers<[1], [0], [0], [1], [0, 0, 1, 1], [], []>} : vector<128x128xbf16>, vector<128x128xbf16>, vector<128x128xf32> -> vector<128x128xf32>
      %24 = arith.truncf %23 : vector<128x128xf32> to vector<128x128xbf16>
      %c0_21 = arith.constant 0 : index
      %c0_22 = arith.constant 0 : index
      %25 = vector.load %arg7[%c0_21, %c0_22] : memref<128x128xbf16, #tpu.memory_space<vmem>>, vector<128x128xbf16>
      tpu.vector_store %arg7[%c0_21, %c0_22], %24 {strides = array<i32>} : memref<128x128xbf16, #tpu.memory_space<vmem>>, vector<128x128xbf16>,
    } else {
    }
    return
  }
  func.func @transform_0(%arg0: i32, %arg1: i32) -> (i32, i32) {
    %c0_i32 = arith.constant 0 : i32
    return %arg0, %arg1 : i32, i32
  }
  func.func @transform_1(%arg0: i32, %arg1: i32) -> (i32, i32) {
    %c0_i32 = arith.constant 0 : i32
    %c0_i32_0 = arith.constant 0 : i32
    return %arg1, %c0_i32 : i32, i32
  }
  func.func @transform_2(%arg0: i32, %arg1: i32) -> (i32, i32) {
    %c0_i32 = arith.constant 0 : i32
    %c0_i32_0 = arith.constant 0 : i32
    %c0_i32_1 = arith.constant 0 : i32
    return %c0_i32, %c0_i32_0 : i32, i32
  }
  func.func @transform_3(%arg0: i32, %arg1: i32) -> (i32, i32) {
    %c0_i32 = arith.constant 0 : i32
    %c0_i32_0 = arith.constant 0 : i32
    %c0_i32_1 = arith.constant 0 : i32
    return %c0_i32, %c0_i32_0 : i32, i32
  }
  func.func @transform_4(%arg0: i32, %arg1: i32) -> (i32, i32) {
    %c0_i32 = arith.constant 0 : i32
    %c0_i32_0 = arith.constant 0 : i32
    %c0_i32_1 = arith.constant 0 : i32
    return %c0_i32, %c0_i32_0 : i32, i32
  }
  func.func @transform_5(%arg0: i32, %arg1: i32) -> (i32, i32) {
    %c0_i32 = arith.constant 0 : i32
    %c0_i32_0 = arith.constant 0 : i32
    return %arg0, %c0_i32 : i32, i32
  }
}

</mosaic_0001>

<bundles_post_ra>
// kernel: tpu_custom_call.1
= control target key start
LH: loop header
LB: loop body
LE: loop exit
PB: predicated region body
PF: predicated region fallthrough
CT: control target
= control target key end

     0   :  { %10 = vsyncpa [#allocation4], 0  ;;  %s1407_s0 = inlined_call_operand.hbm [shape: bf16[128,128], index: 0, kind: input, shape index: {}]   ;;  %s1408_s1 = inlined_call_operand.hbm [shape: bf16[128,128], index: 1, kind: input, shape index: {}]   ;;  %s1409_s2 = inlined_call_operand.hbm [shape: bf16[128,128], index: 2, kind: input, shape index: {}]   ;;  %s1410_s3 = inlined_call_operand.vmem [shape: f32[1,128], index: 3, kind: input, shape index: {}]   ;;  %s1411_s4 = inlined_call_operand.hbm [shape: bf16[128,128], index: 4, kind: input, shape index: {}]   ;;  %s1412_s5 = inlined_call_operand.hbm [shape: bf16[128,128], index: 5, kind: output, shape index: {}]  }
   0x1   :  { %11 = vsyncpa [#allocation7], 0 }
   0x2   :  { %12 = vsyncpa [#allocation10], 0 }
   0x3   :  { %13 = vsyncpa [#allocation5], 0  ;;  %s1278_s18 = smov [#allocation6]   ;;  %s1279_s20 = smov [#allocation3]  }
   0x4   :  { %s31_s19 = sshll.u32 %s1278_s18, 4  ;;  %s19_s21 = sshll.u32 %s1279_s20, 4  ;;  %s32_s19 = int_to_ptr.vmem [resolvable:$true] %s31_s19  ;;  %s1315_s21 = int_to_ptr.vmem [resolvable:$true] %s19_s21 }
   0x5   :  { %s1160_s24 = scalar_lea.hbm %s1408_s1, 1024 }
   0x6   :  { %p1161_p0 = scmp.ne.s32.totalorder %s1408_s1, %s1160_s24  ;;  %p1164_p1 = scmp.lt.u32.totalorder %s1160_s24, %s1408_s1 }
   0x8   :  { %p1166_p2 = pnand %p1164_p1, %p1161_p0 }
   0xa   :  { %1169 = shalt.err (!%p1166_p2)
}
   0xb   :  { %s1170_s29 = scalar_lea.vmem %s32_s19, 1024  ;;  %p1175_p4 = scmp.lt.s32.totalorder %s32_s19, %s32_s19 }
   0xc   :  { %p1171_p3 = scmp.ne.s32.totalorder %s32_s19, %s1170_s29  ;;  %p1176_p5 = scmp.lt.s32.totalorder %s1170_s29, %s1170_s29 }
   0xe   :  { %p1177_p6 = por %p1176_p5, %p1175_p4 }
  0x10   :  { %p1178_p7 = pnand %p1177_p6, %p1171_p3 }
  0x12   :  { %1181 = shalt.err (!%p1178_p7)
}
  0x13   :  { %s1280_s30 = smov 64   ;;  %s1281_s6 = smov 4  }
  0x14   :  { %37 = dma.hbm_to_vmem [thread:$0]  %s1408_s1, 1024, %s32_s19, [#allocation7], %s1280_s30, %s1280_s30, %s1281_s6  }
  0x15   :  { %s1182_s11 = scalar_lea.hbm %s1407_s0, 1024 }
  0x16   :  { %p1183_p8 = scmp.ne.s32.totalorder %s1407_s0, %s1182_s11  ;;  %p1186_p9 = scmp.lt.u32.totalorder %s1182_s11, %s1407_s0 }
  0x18   :  { %p1188_p10 = pnand %p1186_p9, %p1183_p8 }
  0x1a   :  { %1191 = shalt.err (!%p1188_p10)
}
  0x1b   :  { %s1192_s16 = scalar_lea.vmem %s1315_s21, 1024  ;;  %p1197_p12 = scmp.lt.s32.totalorder %s1315_s21, %s1315_s21 }
  0x1c   :  { %p1193_p11 = scmp.ne.s32.totalorder %s1315_s21, %s1192_s16  ;;  %p1198_p13 = scmp.lt.s32.totalorder %s1192_s16, %s1192_s16 }
  0x1e   :  { %p1199_p0 = por %p1198_p13, %p1197_p12 }
  0x20   :  { %p1200_p1 = pnand %p1199_p0, %p1193_p11 }
  0x22   :  { %1203 = shalt.err (!%p1200_p1)
}
  0x23   :  { %25 = dma.hbm_to_vmem [thread:$0]  %s1407_s0, 1024, %s1315_s21, [#allocation4], %s1280_s30, %s1280_s30, %s1281_s6  }
  0x24   :  { %s1282_s18 = smov [#allocation8]   ;;  %s1283_s20 = smov [#allocation9]  }
  0x25   :  { %s43_s19 = sshll.u32 %s1282_s18, 4  ;;  %s57_s22 = sshll.u32 %s1283_s20, 4  ;;  %s44_s19 = int_to_ptr.vmem [resolvable:$true] %s43_s19  ;;  %s1352_s22 = int_to_ptr.vmem [resolvable:$true] %s57_s22 }
  0x26   :  { %s1204_s25 = scalar_lea.hbm %s1409_s2, 1024 }
  0x27   :  { %p1205_p2 = scmp.ne.s32.totalorder %s1409_s2, %s1204_s25  ;;  %p1208_p3 = scmp.lt.u32.totalorder %s1204_s25, %s1409_s2 }
  0x29   :  { %p1210_p4 = pnand %p1208_p3, %p1205_p2 }
  0x2b   :  { %1213 = shalt.err (!%p1210_p4)
}
  0x2c   :  { %s1214_s0 = scalar_lea.vmem %s44_s19, 1024  ;;  %p1219_p6 = scmp.lt.s32.totalorder %s44_s19, %s44_s19 }
  0x2d   :  { %p1215_p5 = scmp.ne.s32.totalorder %s44_s19, %s1214_s0  ;;  %p1220_p7 = scmp.lt.s32.totalorder %s1214_s0, %s1214_s0 }
  0x2f   :  { %p1221_p8 = por %p1220_p7, %p1219_p6 }
  0x31   :  { %p1222_p9 = pnand %p1221_p8, %p1215_p5 }
  0x33   :  { %1225 = shalt.err (!%p1222_p9)
}
  0x34   :  { %49 = dma.hbm_to_vmem [thread:$0]  %s1409_s2, 1024, %s44_s19, [#allocation7], %s1280_s30, %s1280_s30, %s1281_s6  }
  0x35   :  { %s1226_s10 = scalar_lea.hbm %s1411_s4, 1024 }
  0x36   :  { %p1227_p10 = scmp.ne.s32.totalorder %s1411_s4, %s1226_s10  ;;  %p1230_p11 = scmp.lt.u32.totalorder %s1226_s10, %s1411_s4 }
  0x38   :  { %p1232_p12 = pnand %p1230_p11, %p1227_p10 }
  0x3a   :  { %1235 = shalt.err (!%p1232_p12)
}
  0x3b   :  { %s1236_s15 = scalar_lea.vmem %s1352_s22, 1024  ;;  %p1241_p0 = scmp.lt.s32.totalorder %s1352_s22, %s1352_s22 }
  0x3c   :  { %p1237_p13 = scmp.ne.s32.totalorder %s1352_s22, %s1236_s15  ;;  %p1242_p1 = scmp.lt.s32.totalorder %s1236_s15, %s1236_s15 }
  0x3e   :  { %p1243_p2 = por %p1242_p1, %p1241_p0 }
  0x40   :  { %p1244_p3 = pnand %p1243_p2, %p1237_p13 }
  0x42   :  { %1247 = shalt.err (!%p1244_p3)
}
  0x43   :  { %63 = dma.hbm_to_vmem [thread:$0]  %s1411_s4, 1024, %s1352_s22, [#allocation10], %s1280_s30, %s1280_s30, %s1281_s6  }
  0x44   :  { %1270 = dma.done.wait [#allocation4], 1024  }
  0x45   :  { %1271 = vsyncadd [#allocation4], 4294966272 }
  0x46   :  { %1272 = dma.done.wait [#allocation7], 2048  }
  0x47   :  { %1273 = vsyncadd [#allocation7], 4294965248 }
  0x48   :  { %1274 = dma.done.wait [#allocation10], 1024  }
  0x49   :  { %1275 = vsyncadd [#allocation10], 4294966272  ;;  %v1128_v0 = vld [vmem:[#allocation6] sm:$0xff]   ;;  %v1129_v1 = vld [vmem:[#allocation6 + $0x8] sm:$0xff]  }
  0x4a   :  { %1009 = vmatprep.subr.bf16.mxu0 %v1128_v0  ;;  %v1130_v2 = vld [vmem:[#allocation6 + $0x10] sm:$0xff]   ;;  %v1131_v3 = vld [vmem:[#allocation6 + $0x18] sm:$0xff]   ;;  %v1136_v4 = vld [vmem:[#allocation3] sm:$0xff]  }
  0x4b   :  { %1010 = vmatpush3.bf16.msra.mxu0 %v1128_v0  ;;  %1025 = vmatprep.mubr.bf16.mxu0 %v1136_v4  ;;  %v1132_v5 = vld [vmem:[#allocation6 + $0x20] sm:$0xff]   ;;  %v1133_v6 = vld [vmem:[#allocation6 + $0x28] sm:$0xff]   ;;  %v1134_v9 = vld [vmem:[#allocation6 + $0x30] sm:$0xff]  }
  0x4c   :  { %1011 = vmatprep.subr.bf16.mxu0 %v1129_v1  ;;  %v1144_v7 = vld [vmem:[#allocation8] sm:$0xff]   ;;  %v1145_v8 = vld [vmem:[#allocation8 + $0x8] sm:$0xff]   ;;  %v1146_v10 = vld [vmem:[#allocation8 + $0x10] sm:$0xff]  }
  0x4d   :  { %1041 = vmatprep.subr.bf16.mxu1 %v1144_v7  ;;  %v1135_v11 = vld [vmem:[#allocation6 + $0x38] sm:$0xff]   ;;  %v1148_v13 = vld [vmem:[#allocation8 + $0x20] sm:$0xff]   ;;  %v1137_v14 = vld [vmem:[#allocation3 + $0x8] sm:$0xff]  }
  0x4e   :  { %1042 = vmatpush3.bf16.msra.mxu1 %v1144_v7  ;;  %v1147_v12 = vld [vmem:[#allocation8 + $0x18] sm:$0xff]   ;;  %v1138_v15 = vld [vmem:[#allocation3 + $0x10] sm:$0xff]   ;;  %v1149_v16 = vld [vmem:[#allocation8 + $0x28] sm:$0xff]  }
  0x4f   :  { %1012 = vmatpush3.bf16.msra.mxu0 %v1129_v1  ;;  %1043 = vmatprep.subr.bf16.mxu1 %v1145_v8  ;;  %v1150_v17 = vld [vmem:[#allocation8 + $0x30] sm:$0xff]   ;;  %v1139_v18 = vld [vmem:[#allocation3 + $0x18] sm:$0xff]   ;;  %v1140_v19 = vld [vmem:[#allocation3 + $0x20] sm:$0xff]  }
  0x50   :  { %1013 = vmatprep.subr.bf16.mxu0 %v1130_v2  ;;  %v1141_v20 = vld [vmem:[#allocation3 + $0x28] sm:$0xff]   ;;  %v1142_v21 = vld [vmem:[#allocation3 + $0x30] sm:$0xff]   ;;  %v1143_v22 = vld [vmem:[#allocation3 + $0x38] sm:$0xff]  }
  0x51   :  { %v1151_v23 = vld [vmem:[#allocation8 + $0x38] sm:$0xff]   ;;  %v1152_v24 = vld [vmem:[#allocation9] sm:$0xff]   ;;  %v1153_v25 = vld [vmem:[#allocation9 + $0x8] sm:$0xff]  }
  0x52   :  { %1044 = vmatpush3.bf16.msra.mxu1 %v1145_v8  ;;  %v1154_v26 = vld [vmem:[#allocation9 + $0x10] sm:$0xff]   ;;  %v1155_v27 = vld [vmem:[#allocation9 + $0x18] sm:$0xff]   ;;  %v1156_v28 = vld [vmem:[#allocation9 + $0x20] sm:$0xff]  }
  0x53   :  { %1014 = vmatpush3.bf16.msra.mxu0 %v1130_v2  ;;  %1045 = vmatprep.subr.bf16.mxu1 %v1146_v10  ;;  %v1157_v29 = vld [vmem:[#allocation9 + $0x28] sm:$0xff]   ;;  %v1158_v54 = vld [vmem:[#allocation9 + $0x30] sm:$0xff]   ;;  %v1159_v55 = vld [vmem:[#allocation9 + $0x38] sm:$0xff]  }
  0x54   :  { %1015 = vmatprep.subr.bf16.mxu0 %v1131_v3  ;;  %v865_v56 = vld [vmem:[%s1410_s3] ss:$0 sm:$0xff]  ;;  %s1284_s3 = smov [#allocation11]  }
  0x55   :  { %s835_s17 = sshll.u32 %s1284_s3, 4  ;;  %s836_s17 = int_to_ptr.vmem [resolvable:$true] %s835_s17 }
  0x56   :  { %1046 = vmatpush3.bf16.msra.mxu1 %v1146_v10  ;;  %s1248_s18 = scalar_lea.vmem %s836_s17, 1024  ;;  %p1253_p5 = scmp.lt.s32.totalorder %s836_s17, %s836_s17 }
  0x57   :  { %1016 = vmatpush3.bf16.msra.mxu0 %v1131_v3  ;;  %1047 = vmatprep.subr.bf16.mxu1 %v1147_v12  ;;  %p1249_p4 = scmp.ne.s32.totalorder %s836_s17, %s1248_s18  ;;  %p1254_p6 = scmp.lt.s32.totalorder %s1248_s18, %s1248_s18 }
  0x58   :  { %1017 = vmatprep.subr.bf16.mxu0 %v1132_v5 }
  0x59   :  { %p1255_p7 = por %p1254_p6, %p1253_p5 }
  0x5a   :  { %1048 = vmatpush3.bf16.msra.mxu1 %v1147_v12 }
  0x5b   :  { %1018 = vmatpush3.bf16.msra.mxu0 %v1132_v5  ;;  %1049 = vmatprep.subr.bf16.mxu1 %v1148_v13  ;;  %p1256_p8 = pnand %p1255_p7, %p1249_p4 }
  0x5c   :  { %1019 = vmatprep.subr.bf16.mxu0 %v1133_v6 }
  0x5e   :  { %1050 = vmatpush3.bf16.msra.mxu1 %v1148_v13 }
  0x5f   :  { %1020 = vmatpush3.bf16.msra.mxu0 %v1133_v6  ;;  %1051 = vmatprep.subr.bf16.mxu1 %v1149_v16 }
  0x60   :  { %1021 = vmatprep.subr.bf16.mxu0 %v1134_v9 }
  0x62   :  { %1052 = vmatpush3.bf16.msra.mxu1 %v1149_v16 }
  0x63   :  { %1022 = vmatpush3.bf16.msra.mxu0 %v1134_v9  ;;  %1053 = vmatprep.subr.bf16.mxu1 %v1150_v17 }
  0x64   :  { %1023 = vmatprep.subr.bf16.mxu0 %v1135_v11 }
  0x66   :  { %1054 = vmatpush3.bf16.msra.mxu1 %v1150_v17 }
  0x67   :  { %1024 = vmatpush3.bf16.msra.mxu0 %v1135_v11  ;;  %1055 = vmatprep.subr.bf16.mxu1 %v1151_v23 }
  0x68   :  { %1073 = vmatprep.subr.bf16.mxu0 %v1152_v24 }
  0x6a   :  { %1026 = vmatmul.mubr.bf16.vlgmr.msra.gmra.mrb[0].mxu0 %v1137_v14  ;;  %1056 = vmatpush3.bf16.msra.mxu1 %v1151_v23 }
  0x6b   :  { %1029 = vmatprep.mubr.bf16.mxu0 %v1138_v15  ;;  %1105 = vmatprep.subr.bf16.mxu1 %v1152_v24 }
  0x6c   :  { %1074 = vmatpush3.bf16.msra.mxu0 %v1152_v24 }
  0x6d   :  { %1075 = vmatprep.subr.bf16.mxu0 %v1153_v25 }
  0x70   :  { %1076 = vmatpush3.bf16.msra.mxu0 %v1153_v25 }
  0x71   :  { %1077 = vmatprep.subr.bf16.mxu0 %v1154_v26 }
  0x72   :  { %1030 = vmatmul.mubr.bf16.gmra.mrb[4].mxu0 %v1139_v18 }
  0x73   :  { %1033 = vmatprep.mubr.bf16.mxu0 %v1140_v19 }
  0x74   :  { %1078 = vmatpush3.bf16.msra.mxu0 %v1154_v26 }
  0x75   :  { %1079 = vmatprep.subr.bf16.mxu0 %v1155_v27 }
  0x78   :  { %1080 = vmatpush3.bf16.msra.mxu0 %v1155_v27 }
  0x79   :  { %1081 = vmatprep.subr.bf16.mxu0 %v1156_v28 }
  0x7a   :  { %1034 = vmatmul.mubr.bf16.gmra.mrb[8].mxu0 %v1141_v20 }
  0x7b   :  { %1037 = vmatprep.mubr.bf16.mxu0 %v1142_v21 }
  0x7c   :  { %1082 = vmatpush3.bf16.msra.mxu0 %v1156_v28 }
  0x7d   :  { %1083 = vmatprep.subr.bf16.mxu0 %v1157_v29 }
  0x80   :  { %1084 = vmatpush3.bf16.msra.mxu0 %v1157_v29 }
  0x81   :  { %1085 = vmatprep.subr.bf16.mxu0 %v1158_v54 }
  0x82   :  { %1038 = vmatmul.mubr.bf16.gmra.mrb[12].mxu0 %v1143_v22 }
  0x84   :  { %1086 = vmatpush3.bf16.msra.mxu0 %v1158_v54 }
  0x85   :  { %1087 = vmatprep.subr.bf16.mxu0 %v1159_v55 }
  0x88   :  { %1088 = vmatpush3.bf16.msra.mxu0 %v1159_v55 }
 0x13d   :  { %v1027_v30 = vpop.f32.mrb[0].mxu0 }
 0x13e   :  { %v275_v31 = vpop.f32.mrb[1].mxu0 }
 0x13f   :  { %v1028_v32 = vpop.f32.mrb[2].mxu0 }
 0x140   :  { %v390_v33 = vpack.c.bf16 %v1028_v32, %v1027_v30  ;;  %v278_v34 = vpop.f32.mrb[3].mxu0 }
 0x141   :  { %v389_v35 = vpack.c.bf16 %v278_v34, %v275_v31 }
 0x143   :  { %1057 = vmatprep.mubr.bf16.mxu1 %v389_v35 }
 0x144   :  { %1058 = vmatmul.mubr.bf16.vlgmr.msra.gmra.mrb[0].mxu1 %v390_v33 }
 0x145   :  { %v1031_v36 = vpop.f32.mrb[4].mxu0  ;;  %1113 = vmatpush3.bf16.msra.mxu1 %v1152_v24 }
 0x146   :  { %v291_v37 = vpop.f32.mrb[5].mxu0  ;;  %1106 = vmatprep.subr.bf16.mxu1 %v1153_v25 }
 0x147   :  { %v1032_v38 = vpop.f32.mrb[6].mxu0 }
 0x148   :  { %v392_v39 = vpack.c.bf16 %v1032_v38, %v1031_v36  ;;  %v294_v40 = vpop.f32.mrb[7].mxu0 }
 0x149   :  { %v391_v41 = vpack.c.bf16 %v294_v40, %v291_v37  ;;  %1114 = vmatpush3.bf16.msra.mxu1 %v1153_v25 }
 0x14a   :  { %1107 = vmatprep.subr.bf16.mxu1 %v1154_v26 }
 0x14b   :  { %1061 = vmatprep.mubr.bf16.mxu1 %v391_v41 }
 0x14c   :  { %1062 = vmatmul.mubr.bf16.gmra.mrb[4].mxu1 %v392_v39 }
 0x14d   :  { %v1035_v42 = vpop.f32.mrb[8].mxu0  ;;  %1115 = vmatpush3.bf16.msra.mxu1 %v1154_v26 }
 0x14e   :  { %v307_v43 = vpop.f32.mrb[9].mxu0  ;;  %1108 = vmatprep.subr.bf16.mxu1 %v1155_v27 }
 0x14f   :  { %v1036_v44 = vpop.f32.mrb[10].mxu0 }
 0x150   :  { %v394_v45 = vpack.c.bf16 %v1036_v44, %v1035_v42  ;;  %v310_v46 = vpop.f32.mrb[11].mxu0 }
 0x151   :  { %v393_v47 = vpack.c.bf16 %v310_v46, %v307_v43  ;;  %1116 = vmatpush3.bf16.msra.mxu1 %v1155_v27 }
 0x152   :  { %1109 = vmatprep.subr.bf16.mxu1 %v1156_v28 }
 0x153   :  { %1065 = vmatprep.mubr.bf16.mxu1 %v393_v47 }
 0x154   :  { %1066 = vmatmul.mubr.bf16.gmra.mrb[8].mxu1 %v394_v45 }
 0x155   :  { %v1039_v48 = vpop.f32.mrb[12].mxu0  ;;  %1117 = vmatpush3.bf16.msra.mxu1 %v1156_v28 }
 0x156   :  { %v323_v49 = vpop.f32.mrb[13].mxu0  ;;  %1110 = vmatprep.subr.bf16.mxu1 %v1157_v29 }
 0x157   :  { %v1040_v50 = vpop.f32.mrb[14].mxu0 }
 0x158   :  { %v396_v51 = vpack.c.bf16 %v1040_v50, %v1039_v48  ;;  %v326_v52 = vpop.f32.mrb[15].mxu0 }
 0x159   :  { %v395_v53 = vpack.c.bf16 %v326_v52, %v323_v49  ;;  %1118 = vmatpush3.bf16.msra.mxu1 %v1157_v29 }
 0x15a   :  { %1111 = vmatprep.subr.bf16.mxu1 %v1158_v54 }
 0x15b   :  { %1069 = vmatprep.mubr.bf16.mxu1 %v395_v53 }
 0x15c   :  { %1070 = vmatmul.mubr.bf16.gmra.mrb[12].mxu1 %v396_v51 }
 0x15d   :  { %1119 = vmatpush3.bf16.msra.mxu1 %v1158_v54 }
 0x15e   :  { %1112 = vmatprep.subr.bf16.mxu1 %v1159_v55 }
 0x161   :  { %1120 = vmatpush3.bf16.msra.mxu1 %v1159_v55 }
 0x217   :  { %v1059_v57 = vpop.f32.mrb[0].mxu1 }
 0x218   :  { %v511_v58 = vadd.f32 %v1059_v57, %v865_v56  ;;  %v502_v59 = vpop.f32.mrb[1].mxu1 }
 0x219   :  { %v503_v60 = vadd.f32 %v865_v56, %v502_v59  ;;  %v1060_v61 = vpop.f32.mrb[2].mxu1 }
 0x21a   :  { %v514_v62 = vadd.f32 %v1060_v61, %v865_v56  ;;  %v505_v63 = vpop.f32.mrb[3].mxu1  ;;  %v567_v1 = vmax.f32 %v511_v58, 0.0 }
 0x21b   :  { %v506_v0 = vadd.f32 %v865_v56, %v505_v63  ;;  %v565_v3 = vmax.f32 %v503_v60, 0.0 }
 0x21c   :  { %v568_v2 = vmax.f32 %v514_v62, 0.0 }
 0x21d   :  { %v566_v4 = vmax.f32 %v506_v0, 0.0 }
 0x21e   :  { %v582_v5 = vpack.c.bf16 %v568_v2, %v567_v1 }
 0x21f   :  { %v581_v6 = vpack.c.bf16 %v566_v4, %v565_v3  ;;  %v1063_v7 = vpop.f32.mrb[4].mxu1 }
 0x220   :  { %v527_v8 = vadd.f32 %v1063_v7, %v865_v56  ;;  %v518_v9 = vpop.f32.mrb[5].mxu1 }
 0x221   :  { %v519_v10 = vadd.f32 %v865_v56, %v518_v9  ;;  %v1064_v11 = vpop.f32.mrb[6].mxu1  ;;  %1089 = vmatprep.mubr.bf16.mxu0 %v581_v6 }
 0x222   :  { %v530_v12 = vadd.f32 %v1064_v11, %v865_v56  ;;  %v521_v13 = vpop.f32.mrb[7].mxu1  ;;  %1090 = vmatmul.mubr.bf16.vlgmr.msra.gmra.mrb[16].mxu0 %v582_v5  ;;  %v571_v15 = vmax.f32 %v527_v8, 0.0 }
 0x223   :  { %v522_v14 = vadd.f32 %v865_v56, %v521_v13  ;;  %v569_v17 = vmax.f32 %v519_v10, 0.0 }
 0x224   :  { %v572_v16 = vmax.f32 %v530_v12, 0.0 }
 0x225   :  { %v570_v18 = vmax.f32 %v522_v14, 0.0 }
 0x226   :  { %v584_v19 = vpack.c.bf16 %v572_v16, %v571_v15 }
 0x227   :  { %v583_v20 = vpack.c.bf16 %v570_v18, %v569_v17  ;;  %v1067_v21 = vpop.f32.mrb[8].mxu1 }
 0x228   :  { %v543_v22 = vadd.f32 %v1067_v21, %v865_v56  ;;  %v534_v23 = vpop.f32.mrb[9].mxu1 }
 0x229   :  { %v535_v24 = vadd.f32 %v865_v56, %v534_v23  ;;  %v1068_v25 = vpop.f32.mrb[10].mxu1  ;;  %1093 = vmatprep.mubr.bf16.mxu0 %v583_v20 }
 0x22a   :  { %v546_v26 = vadd.f32 %v1068_v25, %v865_v56  ;;  %v537_v27 = vpop.f32.mrb[11].mxu1  ;;  %1094 = vmatmul.mubr.bf16.gmra.mrb[20].mxu0 %v584_v19  ;;  %v575_v29 = vmax.f32 %v543_v22, 0.0 }
 0x22b   :  { %v538_v28 = vadd.f32 %v865_v56, %v537_v27  ;;  %v573_v31 = vmax.f32 %v535_v24, 0.0 }
 0x22c   :  { %v576_v30 = vmax.f32 %v546_v26, 0.0 }
 0x22d   :  { %v574_v32 = vmax.f32 %v538_v28, 0.0 }
 0x22e   :  { %v586_v33 = vpack.c.bf16 %v576_v30, %v575_v29 }
 0x22f   :  { %v585_v34 = vpack.c.bf16 %v574_v32, %v573_v31  ;;  %v1071_v35 = vpop.f32.mrb[12].mxu1 }
 0x230   :  { %v559_v36 = vadd.f32 %v1071_v35, %v865_v56  ;;  %v550_v37 = vpop.f32.mrb[13].mxu1 }
 0x231   :  { %v551_v38 = vadd.f32 %v865_v56, %v550_v37  ;;  %v1072_v39 = vpop.f32.mrb[14].mxu1  ;;  %1097 = vmatprep.mubr.bf16.mxu1 %v585_v34 }
 0x232   :  { %v562_v40 = vadd.f32 %v1072_v39, %v865_v56  ;;  %v553_v41 = vpop.f32.mrb[15].mxu1  ;;  %1098 = vmatmul.mubr.bf16.vlgmr.msra.gmra.mrb[16].mxu1 %v586_v33  ;;  %v579_v43 = vmax.f32 %v559_v36, 0.0 }
 0x233   :  { %v554_v42 = vadd.f32 %v865_v56, %v553_v41  ;;  %v577_v45 = vmax.f32 %v551_v38, 0.0 }
 0x234   :  { %v580_v44 = vmax.f32 %v562_v40, 0.0 }
 0x235   :  { %v578_v46 = vmax.f32 %v554_v42, 0.0 }
 0x236   :  { %v588_v47 = vpack.c.bf16 %v580_v44, %v579_v43 }
 0x237   :  { %v587_v48 = vpack.c.bf16 %v578_v46, %v577_v45 }
 0x239   :  { %1101 = vmatprep.mubr.bf16.mxu1 %v587_v48 }
 0x23a   :  { %1102 = vmatmul.mubr.bf16.gmra.mrb[20].mxu1 %v588_v47 }
 0x2f5   :  { %v1091_v49 = vpop.f32.mrb[16].mxu0 }
 0x2f6   :  { %v687_v50 = vpop.f32.mrb[17].mxu0 }
 0x2f7   :  { %v1092_v51 = vpop.f32.mrb[18].mxu0 }
 0x2f8   :  { %v922_v52 = vpack.c.bf16 %v1092_v51, %v1091_v49  ;;  %v690_v53 = vpop.f32.mrb[19].mxu0 }
 0x2f9   :  { %v917_v54 = vpack.c.bf16 %v690_v53, %v687_v50 }
 0x2fa   :  { %954 = vst [vmem:[#allocation11 + $0x8] sm:$0xff] %v922_v52  }
 0x2fb   :  { %918 = vst [vmem:[#allocation11] sm:$0xff] %v917_v54  }
 0x2fd   :  { %v1095_v55 = vpop.f32.mrb[20].mxu0 }
 0x2fe   :  { %v703_v57 = vpop.f32.mrb[21].mxu0 }
 0x2ff   :  { %v1096_v58 = vpop.f32.mrb[22].mxu0 }
 0x300   :  { %v932_v56 = vpack.c.bf16 %v1096_v58, %v1095_v55  ;;  %v706_v59 = vpop.f32.mrb[23].mxu0 }
 0x301   :  { %v927_v60 = vpack.c.bf16 %v706_v59, %v703_v57 }
 0x302   :  { %956 = vst [vmem:[#allocation11 + $0x18] sm:$0xff] %v932_v56  }
 0x303   :  { %955 = vst [vmem:[#allocation11 + $0x10] sm:$0xff] %v927_v60  }
 0x305   :  { %v1099_v61 = vpop.f32.mrb[16].mxu1 }
 0x306   :  { %v719_v62 = vpop.f32.mrb[17].mxu1 }
 0x307   :  { %v1100_v63 = vpop.f32.mrb[18].mxu1 }
 0x308   :  { %v942_v0 = vpack.c.bf16 %v1100_v63, %v1099_v61  ;;  %v722_v1 = vpop.f32.mrb[19].mxu1 }
 0x309   :  { %v937_v2 = vpack.c.bf16 %v722_v1, %v719_v62 }
 0x30a   :  { %958 = vst [vmem:[#allocation11 + $0x28] sm:$0xff] %v942_v0  }
 0x30b   :  { %957 = vst [vmem:[#allocation11 + $0x20] sm:$0xff] %v937_v2  }
 0x30d   :  { %v1103_v3 = vpop.f32.mrb[20].mxu1 }
 0x30e   :  { %v735_v4 = vpop.f32.mrb[21].mxu1 }
 0x30f   :  { %v1104_v5 = vpop.f32.mrb[22].mxu1 }
 0x310   :  { %v952_v6 = vpack.c.bf16 %v1104_v5, %v1103_v3  ;;  %v738_v7 = vpop.f32.mrb[23].mxu1 }
 0x311   :  { %v947_v8 = vpack.c.bf16 %v738_v7, %v735_v4 }
 0x312   :  { %960 = vst [vmem:[#allocation11 + $0x38] sm:$0xff] %v952_v6  }
 0x313   :  { %959 = vst [vmem:[#allocation11 + $0x30] sm:$0xff] %v947_v8  }
 0x314   :  { %1259 = shalt.err (!%p1256_p8)
}
 0x315   :  { %s1260_s22 = scalar_lea.hbm %s1412_s5, 1024 }
 0x316   :  { %p1261_p9 = scmp.ne.s32.totalorder %s1412_s5, %s1260_s22  ;;  %p1264_p10 = scmp.lt.u32.totalorder %s1260_s22, %s1412_s5 }
 0x318   :  { %p1266_p11 = pnand %p1264_p10, %p1261_p9 }
 0x31a   :  { %1269 = shalt.err (!%p1266_p11)
}
 0x31b   :  { %841 = dma.vmem_to_hbm [thread:$0]  %s836_s17, 1024, %s1412_s5, [#allocation5], %s1280_s30, %s1280_s30, %s1281_s6  }
 0x31c   :  { %1276 = dma.done.wait [#allocation5], 1024  }
 0x31d   :  { %1277 = vsyncadd [#allocation5], 4294966272 }
 0x31e   :  { %845 = vsyncpa [#allocation4], 1 }
 0x31f   :  { %846 = vsyncpa [#allocation7], 1 }
 0x320   :  { %847 = vsyncpa [#allocation10], 1 }
 0x321   :  { %848 = vsyncpa [#allocation5], 1 }

</bundles_post_ra>
